<compile_context>
chip_gen: v6e
topology: v6e:2x2x1
jax: 0.10.0
libtpu: 0.0.40
codegen_flags: <defaults>
</compile_context>

<pallas_src>
import math

import jax
import jax.numpy as jnp
from jax.experimental import pallas as pl
from jax.experimental.pallas import tpu as pltpu


class UnauthorizedProbeAccessError(BaseException):
    pass


# ---------------------------------------------------------------------------
# Pallas identity-copy kernel (tiled, lane-dense, input/output aliased)
# ---------------------------------------------------------------------------

_LANES = 1024      # lane-dense last dim, multiple of 128 -> unmasked stores
_ROW_TILE = 512    # 512 x 1024 f32 = 2 MiB / tile: fits v5e/v6e/v7x VMEM budgets


def _copy_kernel(x_ref, o_ref):
    # Pure pass-through: the probe returns its input unchanged.
    o_ref[...] = x_ref[...]


def _tiling_for(total):
    """Lane-dense slab (rows, _LANES) + row tile for `total` elements."""
    rows = pl.cdiv(total, _LANES)
    if rows >= _ROW_TILE:
        row_tile = _ROW_TILE
        rows = pl.cdiv(rows, row_tile) * row_tile   # rows is a multiple of tile
    else:
        row_tile = rows                             # single block == full dim
    return rows, row_tile


@jax.jit
def _identity_roundtrip(x):
    """Device round-trip of `x` through a tiled Pallas VMEM copy (identity)."""
    orig_shape = x.shape
    total = math.prod(orig_shape)

    rows, row_tile = _tiling_for(total)
    padded_total = rows * _LANES

    itemsize = jnp.dtype(x.dtype).itemsize
    tile_bytes = row_tile * _LANES * itemsize
    # 2 arrays x 2 pipeline buffers x tile + headroom; clamp to a sane range
    # (well under v7x's 64 MiB physical VMEM).
    vmem_limit = int(min(48 << 20, max(4 << 20, 4 * tile_bytes + (2 << 20))))

    copy = pl.pallas_call(
        _copy_kernel,
        out_shape=jax.ShapeDtypeStruct((rows, _LANES), x.dtype),
        grid=(rows // row_tile,),
        in_specs=[pl.BlockSpec((row_tile, _LANES), lambda i: (i, 0))],
        out_specs=pl.BlockSpec((row_tile, _LANES), lambda i: (i, 0)),
        input_output_aliases={0: 0},   # output aliases the padded slab
        compiler_params=pltpu.CompilerParams(
            dimension_semantics=("parallel",),   # megacore: split rows over TCs
            vmem_limit_bytes=vmem_limit,
        ),
    )

    flat = x.reshape(-1)
    if padded_total != total:
        flat = jnp.pad(flat, (0, padded_total - total))
    slab = flat.reshape(rows, _LANES)

    out = copy(slab)
    # Slice off the padded tail before restoring the original NCHW shape.
    return out.reshape(-1)[:total].reshape(orig_shape)


# ---------------------------------------------------------------------------
# Module wrapper
# ---------------------------------------------------------------------------

class SentinelProbeModule:
    """JAX/Pallas port of the PyTorch SentinelProbeModule.

    `authorize_pass()` must be called before every `forward()`; otherwise
    UnauthorizedProbeAccessError is raised.  The forward pass is a semantic
    identity over x.  By default it returns x directly (zero device work);
    set `device_roundtrip=True` to push the tensor through the tiled Pallas
    copy kernel instead.
    """

    def __init__(self, key, device_roundtrip=False):
        if '.' in key:
            raise ValueError('`.` must not appear in key ("{}")'.format(key))
        self.key = key
        self.sentinel = False
        self.device_roundtrip = device_roundtrip

    def authorize_pass(self):
        self.sentinel = True

    def do_probe(self, x):
        # TODO(synk): subclass hook (host-side recording side effect) — no
        # Pallas equivalent; intentionally a no-op here.
        pass

    def forward(self, x):
        if not self.sentinel:
            raise UnauthorizedProbeAccessError()
        # Probe sees a "detached" view (stop_gradient ~ detach).
        self.do_probe(jax.lax.stop_gradient(x))

        # Semantic identity: fastest path is no device work at all.
        y = _identity_roundtrip(x) if self.device_roundtrip else x

        self.sentinel = False
        return y

    __call__ = forward


if __name__ == "__main__":
    key = jax.random.PRNGKey(0)
    x = jax.random.normal(key, (2, 4, 16, 16), dtype=jnp.float32)  # NCHW

    # Use the Pallas round-trip path so the kernel is exercised once.
    probe = SentinelProbeModule("sentinel_probe_0", device_roundtrip=True)

    # Unauthorized pass must raise, as in the PyTorch module.
    raised = False
    try:
        probe(x)
    except UnauthorizedProbeAccessError:
        raised = True
    assert raised, "expected UnauthorizedProbeAccessError on unauthorized pass"

    # Authorized pass: forward is an identity over x (via the Pallas kernel).
    probe.authorize_pass()
    y = jax.block_until_ready(probe(x))

    assert y.shape == x.shape and y.dtype == x.dtype
    assert bool(jnp.all(y == x))
    assert probe.sentinel is False

    # Default (recommended) path: pure identity, zero device work.
    probe_fast = SentinelProbeModule("sentinel_probe_fast")
    probe_fast.authorize_pass()
    y_fast = probe_fast(x)
    assert y_fast is x
    assert probe_fast.sentinel is False

    print("KERNEL_OK")
</pallas_src>

<mosaic_0001>
module attributes {stable_mosaic.version = 11 : i64} {
  func.func @_copy_kernel(%arg0: i32, %arg1: memref<2x1024xf32, #tpu.memory_space<vmem>>, %arg2: memref<2x1024xf32, #tpu.memory_space<vmem>>) attributes {dimension_semantics = [#tpu.dimension_semantics<parallel>], iteration_bounds = array<i64: 1>, scalar_prefetch = 0 : i64, scratch_operands = 0 : i64, tpu.core_type = #tpu.core_type<tc>, window_params = [{transform_indices = @transform_0, window_bounds = array<i64: 2, 1024>}, {transform_indices = @transform_1, window_bounds = array<i64: 2, 1024>}]} {
    %c0 = arith.constant 0 : index
    %c0_0 = arith.constant 0 : index
    %0 = vector.load %arg1[%c0, %c0_0] : memref<2x1024xf32, #tpu.memory_space<vmem>>, vector<2x1024xf32>
    %c0_1 = arith.constant 0 : index
    %c0_2 = arith.constant 0 : index
    %1 = vector.load %arg2[%c0_1, %c0_2] : memref<2x1024xf32, #tpu.memory_space<vmem>>, vector<2x1024xf32>
    tpu.vector_store %arg2[%c0_1, %c0_2], %0 {strides = array<i32>} : memref<2x1024xf32, #tpu.memory_space<vmem>>, vector<2x1024xf32>,
    return
  }
  func.func @transform_0(%arg0: i32) -> (i32, i32) {
    %c0_i32 = arith.constant 0 : i32
    %c0_i32_0 = arith.constant 0 : i32
    return %arg0, %c0_i32 : i32, i32
  }
  func.func @transform_1(%arg0: i32) -> (i32, i32) {
    %c0_i32 = arith.constant 0 : i32
    %c0_i32_0 = arith.constant 0 : i32
    return %arg0, %c0_i32 : i32, i32
  }
}

</mosaic_0001>

<bundles_post_ra>
// kernel: _identity_roundtrip.1
= control target key start
LH: loop header
LB: loop body
LE: loop exit
PB: predicated region body
PF: predicated region fallthrough
CT: control target
= control target key end

     0   :  { %s38_s0 = inlined_call_operand.vmem [shape: f32[2,1024], index: 0, kind: input, shape index: {}, may-alias: {0,1}]   ;;  %s39_s1 = inlined_call_operand.vmem [shape: f32[2,1024], index: 1, kind: output, shape index: {}, may-alias: {0,1}]  }
   0x1   :  { %v8_v0 = vld [vmem:[%s38_s0] sm:$0xff]  ;;  %v9_v1 = vld [vmem:[%s38_s0 + $0x8] sm:$0xff] }
   0x2   :  { %10 = vst [vmem:[%s39_s1] sm:$0xff] %v8_v0  ;;  %11 = vst [vmem:[%s39_s1 + $0x8] sm:$0xff] %v9_v1 }

</bundles_post_ra>
